<compile_context>
chip_gen: v5e
topology: v5e:2x2
jax: 0.10.0
libtpu: 0.0.40
codegen_flags: <defaults>
</compile_context>

<pallas_src>
import numpy as np
import jax
import jax.numpy as jnp
from jax import lax
from jax.experimental import pallas as pl
from jax.experimental.pallas import tpu as pltpu


def _vmem_limit_bytes():
    cap = 64 * 1024 * 1024            # conservative fallback (v7x physical VMEM)
    try:
        info = pltpu.get_tpu_info()
        cap = int(getattr(info, "vmem_capacity_bytes", cap))
    except Exception:
        pass
    # -> 40 MiB on v7x (64 MiB physical), 64 MiB on v5e/v6e (128 MiB physical).
    return min(64 * 1024 * 1024, (cap * 5) // 8)


# ---------------------------------------------------------------------------
# Kernel 1: fused QKV projection  (rows, C) @ (C, 3C) -> (rows, 3C) bf16
# ---------------------------------------------------------------------------
def _qkv_proj_kernel(x_ref, w_ref, o_ref):
    o_ref[...] = jnp.dot(x_ref[...], w_ref[...],
                         preferred_element_type=jnp.float32).astype(o_ref.dtype)


def _qkv_projection(x2d, w_fused, *, tm):
    m, c = x2d.shape
    three_c = w_fused.shape[1]
    return pl.pallas_call(
        _qkv_proj_kernel,
        out_shape=jax.ShapeDtypeStruct((m, three_c), jnp.bfloat16),
        grid_spec=pltpu.PrefetchScalarGridSpec(
            num_scalar_prefetch=0,
            grid=(m // tm,),
            in_specs=[
                pl.BlockSpec((tm, c), lambda i: (i, 0)),         # x row tile
                pl.BlockSpec((c, three_c), lambda i: (0, 0)),    # fused W (resident)
            ],
            out_specs=pl.BlockSpec((tm, three_c), lambda i: (i, 0)),
        ),
        compiler_params=pltpu.CompilerParams(
            dimension_semantics=("parallel",),
            vmem_limit_bytes=_vmem_limit_bytes()),
    )(x2d, w_fused)


# ---------------------------------------------------------------------------
# Kernel 2: multi-head attention + output projection
# ---------------------------------------------------------------------------
def _make_attn_kernel(tq, num_heads, head_dim, C, n_valid, n_pad):
    need_mask = n_valid < n_pad

    def kernel(qkv_ref, wp_ref, b_ref, o_ref):
        # qkv_ref: (n_pad, 3C) bf16 (resident per batch)  wp_ref: (C, C) bf16
        # b_ref:   (1, C) f32                             o_ref:  (tq, C)
        qi = pl.program_id(1)
        q_start = pl.multiple_of(qi * tq, tq)

        if need_mask:
            key_ids = lax.broadcasted_iota(jnp.int32, (tq, n_pad), 1)

        ctx_parts = []
        for h in range(num_heads):                       # unrolled, static slices
            q = qkv_ref[pl.ds(q_start, tq), h * head_dim:(h + 1) * head_dim]
            k = qkv_ref[:, C + h * head_dim: C + (h + 1) * head_dim]
            v = qkv_ref[:, 2 * C + h * head_dim: 2 * C + (h + 1) * head_dim]

            # q @ k^T as an NT matmul (contract head_dim) -> no XLU transpose.
            s = lax.dot_general(q, k, (((1,), (1,)), ((), ())),
                                preferred_element_type=jnp.float32)   # (tq, n_pad)
            if need_mask:
                s = jnp.where(key_ids < n_valid, s, -1e30)
            s = s - jnp.max(s, axis=-1, keepdims=True)
            p = jnp.exp(s)
            denom = jnp.sum(p, axis=-1, keepdims=True)                # (tq, 1)

            ctx = jnp.dot(p.astype(jnp.bfloat16), v,
                          preferred_element_type=jnp.float32)         # (tq, hd)
            # Deferred softmax normalisation: scale the small PV result.
            ctx = ctx * pl.reciprocal(denom, approx=True)
            ctx_parts.append(ctx.astype(jnp.bfloat16))

        ctx_all = (ctx_parts[0] if num_heads == 1
                   else jnp.concatenate(ctx_parts, axis=-1))          # (tq, C)

        # Single K=C-deep output projection + bias.
        out = jnp.dot(ctx_all, wp_ref[...], preferred_element_type=jnp.float32)
        out = out + b_ref[...]
        o_ref[...] = out.astype(o_ref.dtype)

    return kernel


# ---------------------------------------------------------------------------
# Parameter prep (one-time; NOT in the per-call hot path)
# ---------------------------------------------------------------------------
def prepare_attention_params(w_qkv, w_proj, b_proj, num_heads):
    """w_qkv: (3C, C) nn.Linear layout; w_proj: (C, C); b_proj: (C,)."""
    three_c, C = w_qkv.shape
    assert three_c == 3 * C and C % num_heads == 0
    head_dim = C // num_heads
    scale = float(head_dim) ** -0.5

    w_fused = jnp.asarray(w_qkv, jnp.float32).T          # (C, 3C): cols = [q|k|v]
    w_fused = w_fused.at[:, :C].multiply(scale)          # fold `scale` into Wq
    wp = jnp.asarray(w_proj, jnp.float32).T              # (C, C): out = ctx @ wp
    b2 = jnp.asarray(b_proj, jnp.float32).reshape(1, C)

    return (w_fused.astype(jnp.bfloat16), wp.astype(jnp.bfloat16), b2, num_heads)


# ---------------------------------------------------------------------------
# Forward wrapper
# ---------------------------------------------------------------------------
def attention_pallas(x, params):
    """x: (B, N, C); params from prepare_attention_params."""
    w_qkv_fused, w_proj_t, bias2d, num_heads = params
    B, N, C = x.shape
    head_dim = C // num_heads
    three_c = 3 * C

    n_pad = ((N + 127) // 128) * 128
    tq = 256 if (n_pad % 256 == 0 and n_pad >= 512) else 128
    n_qt = n_pad // tq

    x_bf = x.astype(jnp.bfloat16)
    if n_pad != N:
        x_bf = jnp.pad(x_bf, ((0, 0), (0, n_pad - N), (0, 0)))

    # Fused QKV projection (Pallas matmul), computed exactly once per token.
    m = B * n_pad
    tm = 256 if m % 256 == 0 else 128
    qkv = _qkv_projection(x_bf.reshape(m, C), w_qkv_fused, tm=tm)
    qkv = qkv.reshape(B, n_pad, three_c)

    kernel = _make_attn_kernel(tq, num_heads, head_dim, C, N, n_pad)
    out = pl.pallas_call(
        kernel,
        out_shape=jax.ShapeDtypeStruct((B, n_pad, C), x.dtype),
        grid_spec=pltpu.PrefetchScalarGridSpec(
            num_scalar_prefetch=0,
            grid=(B, n_qt),
            in_specs=[
                pl.BlockSpec((None, n_pad, three_c), lambda b, qi: (b, 0, 0)),  # QKV
                pl.BlockSpec((C, C), lambda b, qi: (0, 0)),                     # Wproj
                pl.BlockSpec((1, C), lambda b, qi: (0, 0)),                     # bias
            ],
            out_specs=pl.BlockSpec((None, tq, C), lambda b, qi: (b, qi, 0)),
        ),
        compiler_params=pltpu.CompilerParams(
            dimension_semantics=("parallel", "parallel"),
            vmem_limit_bytes=_vmem_limit_bytes()),
    )(qkv, w_proj_t, bias2d)

    return out[:, :N, :] if n_pad != N else out


# ---------------------------------------------------------------------------
# Pure-JAX f32 reference (mirrors the PyTorch forward, eval mode)
# ---------------------------------------------------------------------------
def attention_ref(x, w_qkv, w_proj, b_proj, num_heads):
    B, N, C = x.shape
    head_dim = C // num_heads
    scale = float(head_dim) ** -0.5
    qkv = jnp.einsum('bnc,oc->bno', x, w_qkv)                  # (B, N, 3C)
    qkv = qkv.reshape(B, N, 3, num_heads, head_dim).transpose(2, 0, 3, 1, 4)
    q, k, v = qkv[0], qkv[1], qkv[2]                           # (B, H, N, hd)
    q = q * scale
    attn = jnp.einsum('bhqd,bhkd->bhqk', q, k)
    attn = jax.nn.softmax(attn, axis=-1)
    out = jnp.einsum('bhqk,bhkd->bhqd', attn, v)
    out = out.transpose(0, 2, 1, 3).reshape(B, N, C)
    return jnp.einsum('bnc,oc->bno', out, w_proj) + b_proj


if __name__ == "__main__":
    # Small shapes consistent with the module: B=2, N=8 tokens, dim=32, 4 heads.
    B, N, C, H = 2, 8, 32, 4
    key = jax.random.PRNGKey(0)
    kx, kq, kp, kb = jax.random.split(key, 4)

    x = jax.random.normal(kx, (B, N, C), dtype=jnp.float32)
    # nn.Linear layout: weight (out_features, in_features).
    w_qkv = jax.random.normal(kq, (3 * C, C), dtype=jnp.float32) * 0.05
    w_proj = jax.random.normal(kp, (C, C), dtype=jnp.float32) * 0.05
    b_proj = jax.random.normal(kb, (C,), dtype=jnp.float32) * 0.05

    params = prepare_attention_params(w_qkv, w_proj, b_proj, H)   # one-time prep
    out = attention_pallas(x, params)
    out = jax.block_until_ready(out)

    ref = attention_ref(x, w_qkv, w_proj, b_proj, H)
    # bf16 MXU inputs + approx reciprocal -> compare at bf16-level tolerance.
    np.testing.assert_allclose(np.asarray(out, dtype=np.float32),
                               np.asarray(ref), rtol=3e-2, atol=3e-2)
    print("KERNEL_OK")
</pallas_src>

<mosaic_0001>
module attributes {stable_mosaic.version = 11 : i64} {
  func.func @_qkv_proj_kernel(%arg0: i32, %arg1: memref<256x32xbf16, #tpu.memory_space<vmem>>, %arg2: memref<32x96xbf16, #tpu.memory_space<vmem>>, %arg3: memref<256x96xbf16, #tpu.memory_space<vmem>>) attributes {dimension_semantics = [#tpu.dimension_semantics<parallel>], iteration_bounds = array<i64: 1>, scalar_prefetch = 0 : i64, scratch_operands = 0 : i64, tpu.core_type = #tpu.core_type<tc>, window_params = [{transform_indices = @transform_0, window_bounds = array<i64: 256, 32>}, {pipeline_mode = #tpu.pipeline_mode<synchronous>, transform_indices = @transform_1, window_bounds = array<i64: 32, 96>}, {transform_indices = @transform_2, window_bounds = array<i64: 256, 96>}]} {
    %c0 = arith.constant 0 : index
    %c0_0 = arith.constant 0 : index
    %0 = vector.load %arg1[%c0, %c0_0] : memref<256x32xbf16, #tpu.memory_space<vmem>>, vector<256x32xbf16>
    %c0_1 = arith.constant 0 : index
    %c0_2 = arith.constant 0 : index
    %1 = vector.load %arg2[%c0_1, %c0_2] : memref<32x96xbf16, #tpu.memory_space<vmem>>, vector<32x96xbf16>
    %cst = arith.constant dense<0.000000e+00> : vector<256x96xf32>
    %2 = tpu.matmul %0, %1, %cst {dimension_numbers = #tpu.dot_dimension_numbers<[1], [0], [0], [1], [0, 0, 1, 1], [], []>} : vector<256x32xbf16>, vector<32x96xbf16>, vector<256x96xf32> -> vector<256x96xf32>
    %3 = arith.truncf %2 : vector<256x96xf32> to vector<256x96xbf16>
    %c0_3 = arith.constant 0 : index
    %c0_4 = arith.constant 0 : index
    %4 = vector.load %arg3[%c0_3, %c0_4] : memref<256x96xbf16, #tpu.memory_space<vmem>>, vector<256x96xbf16>
    tpu.vector_store %arg3[%c0_3, %c0_4], %3 {strides = array<i32>} : memref<256x96xbf16, #tpu.memory_space<vmem>>, vector<256x96xbf16>,
    return
  }
  func.func @transform_0(%arg0: i32) -> (i32, i32) {
    %c0_i32 = arith.constant 0 : i32
    %c0_i32_0 = arith.constant 0 : i32
    return %arg0, %c0_i32 : i32, i32
  }
  func.func @transform_1(%arg0: i32) -> (i32, i32) {
    %c0_i32 = arith.constant 0 : i32
    %c0_i32_0 = arith.constant 0 : i32
    %c0_i32_1 = arith.constant 0 : i32
    return %c0_i32, %c0_i32_0 : i32, i32
  }
  func.func @transform_2(%arg0: i32) -> (i32, i32) {
    %c0_i32 = arith.constant 0 : i32
    %c0_i32_0 = arith.constant 0 : i32
    return %arg0, %c0_i32 : i32, i32
  }
}

</mosaic_0001>

<bundles_post_ra>
// kernel: tpu_custom_call.1
= control target key start
LH: loop header
LB: loop body
LE: loop exit
PB: predicated region body
PF: predicated region fallthrough
CT: control target
= control target key end

     0   :  { %vm140_vm0 = vcmask 261120   ;;  %vm310_vm1 = vcmask 781312   ;;  %s672_s1 = inlined_call_operand.vmem [shape: bf16[32,96], index: 1, kind: input, shape index: {}]   ;;  %s673_s0 = inlined_call_operand.vmem [shape: bf16[256,32], index: 0, kind: input, shape index: {}]   ;;  %s674_s2 = inlined_call_operand.vmem [shape: bf16[256,96], index: 2, kind: output, shape index: {}]  }
   0x1   :  { %v452_v0 = vld [vmem:[%s672_s1 + $0x8] sm:$0xff]  ;;  %v451_v1 = vld [vmem:[%s672_s1] sm:$0xff]  ;;  %v437_v10 = vld [vmem:[%s673_s0 + $0x10] sm:$0xff] }
   0x2   :  { %195 = vmatpush.bf16.msra.mxu0 %v452_v0  ;;  %453 = vmatpush.bf16.msra.mxu1 %v452_v0  ;;  %v435_v2 = vld [vmem:[%s673_s0] sm:$0xff]  ;;  %v436_v6 = vld [vmem:[%s673_s0 + $0x8] sm:$0xff]  ;;  %v441_v11 = vld [vmem:[%s673_s0 + $0x30] sm:$0xff] }
   0x3   :  { %454 = vmatpush.bf16.msra.mxu2 %v452_v0  ;;  %455 = vmatpush.bf16.msra.mxu3 %v452_v0  ;;  %v439_v3 = vld [vmem:[%s673_s0 + $0x20] sm:$0xff]  ;;  %v440_v7 = vld [vmem:[%s673_s0 + $0x28] sm:$0xff]  ;;  %v445_v12 = vld [vmem:[%s673_s0 + $0x50] sm:$0xff] }
   0x4   :  { %v443_v4 = vld [vmem:[%s673_s0 + $0x40] sm:$0xff]  ;;  %v444_v8 = vld [vmem:[%s673_s0 + $0x48] sm:$0xff]  ;;  %v449_v13 = vld [vmem:[%s673_s0 + $0x70] sm:$0xff] }
   0x5   :  { %v447_v5 = vld [vmem:[%s673_s0 + $0x60] sm:$0xff]  ;;  %v448_v9 = vld [vmem:[%s673_s0 + $0x68] sm:$0xff]  ;;  %v438_v14 = vld [vmem:[%s673_s0 + $0x18] sm:$0xff] }
   0x6   :  { %196 = vmatpush.bf16.msra.mxu0 %v451_v1  ;;  %456 = vmatpush.bf16.msra.mxu1 %v451_v1  ;;  %v442_v15 = vld [vmem:[%s673_s0 + $0x38] sm:$0xff] }
   0x7   :  { %457 = vmatpush.bf16.msra.mxu2 %v451_v1  ;;  %458 = vmatpush.bf16.msra.mxu3 %v451_v1  ;;  %v446_v16 = vld [vmem:[%s673_s0 + $0x58] sm:$0xff] }
   0x8   :  { %v450_v17 = vld [vmem:[%s673_s0 + $0x78] sm:$0xff] }
   0x9   :  { %419 = vmatmul.msk.bf16.vlgmr.msra.gmra.mxu0 %vm140_vm0, %v435_v2  ;;  %423 = vmatmul.msk.bf16.vlgmr.msra.gmra.mxu1 %vm140_vm0, %v439_v3 }
   0xa   :  { %427 = vmatmul.msk.bf16.vlgmr.msra.gmra.mxu2 %vm140_vm0, %v443_v4  ;;  %431 = vmatmul.msk.bf16.vlgmr.msra.gmra.mxu3 %vm140_vm0, %v447_v5 }
  0x19   :  { %420 = vmatmul.msk.bf16.gmra.mxu0 %vm140_vm0, %v436_v6  ;;  %424 = vmatmul.msk.bf16.gmra.mxu1 %vm140_vm0, %v440_v7 }
  0x1a   :  { %428 = vmatmul.msk.bf16.gmra.mxu2 %vm140_vm0, %v444_v8  ;;  %432 = vmatmul.msk.bf16.gmra.mxu3 %vm140_vm0, %v448_v9 }
  0x29   :  { %421 = vmatmul.msk.bf16.gmra.mxu0 %vm140_vm0, %v437_v10  ;;  %425 = vmatmul.msk.bf16.gmra.mxu1 %vm140_vm0, %v441_v11 }
  0x2a   :  { %429 = vmatmul.msk.bf16.gmra.mxu2 %vm140_vm0, %v445_v12  ;;  %433 = vmatmul.msk.bf16.gmra.mxu3 %vm140_vm0, %v449_v13 }
  0x39   :  { %422 = vmatmul.msk.bf16.gmra.mxu0 %vm140_vm0, %v438_v14  ;;  %426 = vmatmul.msk.bf16.gmra.mxu1 %vm140_vm0, %v442_v15 }
  0x3a   :  { %430 = vmatmul.msk.bf16.gmra.mxu2 %vm140_vm0, %v446_v16  ;;  %434 = vmatmul.msk.bf16.gmra.mxu3 %vm140_vm0, %v450_v17 }
  0x86   :  { %v198_v18 = vpop.f32.mrf.mxu0  ;;  %v218_v19 = vpop.f32.mrf.mxu1 }
  0x87   :  { %v278_v20 = vpack.c.bf16 %v198_v18, %v198_v18  ;;  %v286_v21 = vpack.c.bf16 %v218_v19, %v218_v19 }
  0x89   :  { %311 = vst.msk [vmem:[%s674_s2] sm:$0xf] %vm310_vm1, %v278_v20 }
  0x8a   :  { %319 = vst.msk [vmem:[%s674_s2 + $0x20] sm:$0xf] %vm310_vm1, %v286_v21 }
  0x8d   :  { %v238_v22 = vpop.f32.mrf.mxu2  ;;  %v258_v23 = vpop.f32.mrf.mxu3 }
  0x8e   :  { %v294_v24 = vpack.c.bf16 %v238_v22, %v238_v22  ;;  %v302_v25 = vpack.c.bf16 %v258_v23, %v258_v23  ;;  %v200_v26 = vpop.f32.mrf.mxu0  ;;  %v220_v27 = vpop.f32.mrf.mxu1 }
  0x8f   :  { %v279_v28 = vpack.c.bf16 %v200_v26, %v200_v26  ;;  %v287_v29 = vpack.c.bf16 %v220_v27, %v220_v27 }
  0x90   :  { %327 = vst.msk [vmem:[%s674_s2 + $0x40] sm:$0xf] %vm310_vm1, %v294_v24 }
  0x91   :  { %335 = vst.msk [vmem:[%s674_s2 + $0x60] sm:$0xf] %vm310_vm1, %v302_v25 }
  0x92   :  { %312 = vst.msk [vmem:[%s674_s2 + $0x4] sm:$0xf] %vm310_vm1, %v279_v28 }
  0x93   :  { %320 = vst.msk [vmem:[%s674_s2 + $0x24] sm:$0xf] %vm310_vm1, %v287_v29 }
  0x95   :  { %v240_v30 = vpop.f32.mrf.mxu2  ;;  %v260_v31 = vpop.f32.mrf.mxu3 }
  0x96   :  { %v295_v32 = vpack.c.bf16 %v240_v30, %v240_v30  ;;  %v303_v33 = vpack.c.bf16 %v260_v31, %v260_v31  ;;  %v203_v34 = vpop.f32.mrf.mxu0  ;;  %v223_v35 = vpop.f32.mrf.mxu1 }
  0x97   :  { %v280_v36 = vpack.c.bf16 %v203_v34, %v203_v34  ;;  %v288_v37 = vpack.c.bf16 %v223_v35, %v223_v35 }
  0x98   :  { %328 = vst.msk [vmem:[%s674_s2 + $0x44] sm:$0xf] %vm310_vm1, %v295_v32 }
  0x99   :  { %336 = vst.msk [vmem:[%s674_s2 + $0x64] sm:$0xf] %vm310_vm1, %v303_v33 }
  0x9a   :  { %313 = vst.msk [vmem:[%s674_s2 + $0x8] sm:$0xf] %vm310_vm1, %v280_v36 }
  0x9b   :  { %321 = vst.msk [vmem:[%s674_s2 + $0x28] sm:$0xf] %vm310_vm1, %v288_v37 }
  0x9d   :  { %v243_v38 = vpop.f32.mrf.mxu2  ;;  %v263_v39 = vpop.f32.mrf.mxu3 }
  0x9e   :  { %v296_v40 = vpack.c.bf16 %v243_v38, %v243_v38  ;;  %v304_v41 = vpack.c.bf16 %v263_v39, %v263_v39  ;;  %v205_v42 = vpop.f32.mrf.mxu0  ;;  %v225_v43 = vpop.f32.mrf.mxu1 }
  0x9f   :  { %v281_v44 = vpack.c.bf16 %v205_v42, %v205_v42  ;;  %v289_v45 = vpack.c.bf16 %v225_v43, %v225_v43 }
  0xa0   :  { %329 = vst.msk [vmem:[%s674_s2 + $0x48] sm:$0xf] %vm310_vm1, %v296_v40 }
  0xa1   :  { %337 = vst.msk [vmem:[%s674_s2 + $0x68] sm:$0xf] %vm310_vm1, %v304_v41 }
  0xa2   :  { %314 = vst.msk [vmem:[%s674_s2 + $0xc] sm:$0xf] %vm310_vm1, %v281_v44 }
  0xa3   :  { %322 = vst.msk [vmem:[%s674_s2 + $0x2c] sm:$0xf] %vm310_vm1, %v289_v45 }
  0xa5   :  { %v245_v46 = vpop.f32.mrf.mxu2  ;;  %v265_v47 = vpop.f32.mrf.mxu3 }
  0xa6   :  { %v297_v48 = vpack.c.bf16 %v245_v46, %v245_v46  ;;  %v305_v49 = vpack.c.bf16 %v265_v47, %v265_v47  ;;  %v208_v50 = vpop.f32.mrf.mxu0  ;;  %v228_v51 = vpop.f32.mrf.mxu1 }
  0xa7   :  { %v282_v52 = vpack.c.bf16 %v208_v50, %v208_v50  ;;  %v290_v53 = vpack.c.bf16 %v228_v51, %v228_v51 }
  0xa8   :  { %330 = vst.msk [vmem:[%s674_s2 + $0x4c] sm:$0xf] %vm310_vm1, %v297_v48 }
  0xa9   :  { %338 = vst.msk [vmem:[%s674_s2 + $0x6c] sm:$0xf] %vm310_vm1, %v305_v49 }
  0xaa   :  { %315 = vst.msk [vmem:[%s674_s2 + $0x10] sm:$0xf] %vm310_vm1, %v282_v52 }
  0xab   :  { %323 = vst.msk [vmem:[%s674_s2 + $0x30] sm:$0xf] %vm310_vm1, %v290_v53 }
  0xad   :  { %v248_v54 = vpop.f32.mrf.mxu2  ;;  %v268_v55 = vpop.f32.mrf.mxu3 }
  0xae   :  { %v298_v56 = vpack.c.bf16 %v248_v54, %v248_v54  ;;  %v306_v57 = vpack.c.bf16 %v268_v55, %v268_v55  ;;  %v210_v58 = vpop.f32.mrf.mxu0  ;;  %v230_v59 = vpop.f32.mrf.mxu1 }
  0xaf   :  { %v283_v60 = vpack.c.bf16 %v210_v58, %v210_v58  ;;  %v291_v61 = vpack.c.bf16 %v230_v59, %v230_v59 }
  0xb0   :  { %331 = vst.msk [vmem:[%s674_s2 + $0x50] sm:$0xf] %vm310_vm1, %v298_v56 }
  0xb1   :  { %339 = vst.msk [vmem:[%s674_s2 + $0x70] sm:$0xf] %vm310_vm1, %v306_v57 }
  0xb2   :  { %316 = vst.msk [vmem:[%s674_s2 + $0x14] sm:$0xf] %vm310_vm1, %v283_v60 }
  0xb3   :  { %324 = vst.msk [vmem:[%s674_s2 + $0x34] sm:$0xf] %vm310_vm1, %v291_v61 }
  0xb5   :  { %v250_v62 = vpop.f32.mrf.mxu2  ;;  %v270_v63 = vpop.f32.mrf.mxu3 }
  0xb6   :  { %v299_v0 = vpack.c.bf16 %v250_v62, %v250_v62  ;;  %v307_v1 = vpack.c.bf16 %v270_v63, %v270_v63  ;;  %v213_v2 = vpop.f32.mrf.mxu0  ;;  %v233_v3 = vpop.f32.mrf.mxu1 }
  0xb7   :  { %v284_v4 = vpack.c.bf16 %v213_v2, %v213_v2  ;;  %v292_v5 = vpack.c.bf16 %v233_v3, %v233_v3 }
  0xb8   :  { %332 = vst.msk [vmem:[%s674_s2 + $0x54] sm:$0xf] %vm310_vm1, %v299_v0 }
  0xb9   :  { %340 = vst.msk [vmem:[%s674_s2 + $0x74] sm:$0xf] %vm310_vm1, %v307_v1 }
  0xba   :  { %317 = vst.msk [vmem:[%s674_s2 + $0x18] sm:$0xf] %vm310_vm1, %v284_v4 }
  0xbb   :  { %325 = vst.msk [vmem:[%s674_s2 + $0x38] sm:$0xf] %vm310_vm1, %v292_v5 }
  0xbd   :  { %v253_v6 = vpop.f32.mrf.mxu2  ;;  %v273_v7 = vpop.f32.mrf.mxu3 }
  0xbe   :  { %v300_v8 = vpack.c.bf16 %v253_v6, %v253_v6  ;;  %v308_v9 = vpack.c.bf16 %v273_v7, %v273_v7  ;;  %v215_v10 = vpop.f32.mrf.mxu0  ;;  %v235_v11 = vpop.f32.mrf.mxu1 }
  0xbf   :  { %v285_v12 = vpack.c.bf16 %v215_v10, %v215_v10  ;;  %v293_v13 = vpack.c.bf16 %v235_v11, %v235_v11 }
  0xc0   :  { %333 = vst.msk [vmem:[%s674_s2 + $0x58] sm:$0xf] %vm310_vm1, %v300_v8 }
  0xc1   :  { %341 = vst.msk [vmem:[%s674_s2 + $0x78] sm:$0xf] %vm310_vm1, %v308_v9 }
  0xc2   :  { %318 = vst.msk [vmem:[%s674_s2 + $0x1c] sm:$0xf] %vm310_vm1, %v285_v12 }
  0xc3   :  { %326 = vst.msk [vmem:[%s674_s2 + $0x3c] sm:$0xf] %vm310_vm1, %v293_v13 }
  0xc5   :  { %v255_v14 = vpop.f32.mrf.mxu2  ;;  %v275_v15 = vpop.f32.mrf.mxu3 }
  0xc6   :  { %v301_v16 = vpack.c.bf16 %v255_v14, %v255_v14  ;;  %v309_v17 = vpack.c.bf16 %v275_v15, %v275_v15 }
  0xc8   :  { %334 = vst.msk [vmem:[%s674_s2 + $0x5c] sm:$0xf] %vm310_vm1, %v301_v16 }
  0xc9   :  { %342 = vst.msk [vmem:[%s674_s2 + $0x7c] sm:$0xf] %vm310_vm1, %v309_v17 }

</bundles_post_ra>
